<compile_context>
chip_gen: v5e
topology: v5e:2x2
jax: 0.10.0
libtpu: 0.0.40
codegen_flags: <defaults>
</compile_context>

<pallas_src>
import jax
import jax.numpy as jnp
from jax import lax
from jax.experimental import pallas as pl
from jax.experimental.pallas import tpu as pltpu


def _r8(n):
    """Round up to a multiple of 8 (sublane tile)."""
    return ((n + 7) // 8) * 8


# TODO(synk): only the default type='RNN' forward path is implemented; the
# type='LSTM' branch and init_hidden(static=...) config paths are out of scope.
def contextualized_sigmoid_kernel(
        x_ref,     # (B, T, C)        context, batch_first
        obs_ref,   # (B*T, E)         observation (squeezed)
        h0_ref,    # (1, B, H)        initial hidden state
        slab_ref,  # (R, W)           packed weights/biases (see prepare_kernel_params)
        out_ref,   # (B*T + B, W)     packed output: theta | prob | last hidden
):
    B, T, C = x_ref.shape
    H = h0_ref.shape[2]
    E = obs_ref.shape[1]
    BT = B * T

    # ---- unpack the single weight slab with static, sublane-aligned offsets ----
    slab = slab_ref[...]
    off_wih = 8
    off_whh = off_wih + _r8(C)
    off_w1 = off_whh + _r8(H)
    off_w2 = off_w1 + _r8(H)

    brnn = slab[0:1, :H]                         # b_ih + b_hh
    b1 = slab[1:2, :H]                           # fc1.bias
    b2 = slab[2:3, :E]                           # fc.bias
    wih = slab[off_wih:off_wih + C, :H]          # rnn.weight_ih_l0^T
    whh = slab[off_whh:off_whh + H, :H]          # rnn.weight_hh_l0^T
    w1 = slab[off_w1:off_w1 + H, :H]             # fc1.weight^T
    w2 = slab[off_w2:off_w2 + H, :E]             # fc.weight^T

    # ---- hoisted input projection: one MXU call for every (b, t) position ----
    x_flat = x_ref[...].reshape(BT, C)           # (b, t) row order
    pre = jnp.dot(x_flat, wih, preferred_element_type=jnp.float32) + brnn   # (BT, H)

    # ---- recurrence: fully unrolled static loop, hidden state in vregs only ----
    h = h0_ref[0]                                # (B, H)
    hs = []
    for t in range(T):
        # gather the B rows for this time step (off the serial dependency chain)
        pre_t = jnp.concatenate(
            [pre[b * T + t:b * T + t + 1, :] for b in range(B)], axis=0)    # (B, H)
        h = jnp.tanh(jnp.dot(h, whh, preferred_element_type=jnp.float32) + pre_t)
        hs.append(h)

    # assemble the RNN output slab in PyTorch (b, t) row order — still values,
    # no VMEM round-trip before the MLP head.
    seq = jnp.concatenate(
        [jnp.concatenate([hs[t][b:b + 1, :] for t in range(T)], axis=0)
         for b in range(B)], axis=0)             # (B*T, H)

    # ---- MLP head on all positions ----
    z = jnp.maximum(seq, 0.0)                                                # relu
    z = jnp.maximum(
        jnp.dot(z, w1, preferred_element_type=jnp.float32) + b1, 0.0)        # fc1 + relu
    theta = jnp.dot(z, w2, preferred_element_type=jnp.float32) + b2          # (BT, E)

    # diag(observation @ theta^T) == row-wise dot -> VPU multiply + lane reduce
    logits = jnp.sum(obs_ref[...] * theta, axis=-1, keepdims=True)           # (BT, 1)
    prob = jax.nn.sigmoid(logits)

    # ---- single packed output buffer (split in the wrapper) ----
    out_ref[...] = jnp.zeros_like(out_ref)
    out_ref[0:BT, 0:E] = theta
    out_ref[0:BT, E:E + 1] = prob
    out_ref[BT:BT + B, 0:H] = h


def prepare_kernel_params(params):
    """One-time repack of the PyTorch-layout parameters into a single f32 slab.

    Slab layout (width W = max(H, E + 1), each block padded to 8 rows):
      rows 0..7            : [b_ih + b_hh ; fc1.bias ; fc.bias ; pad]
      rows 8..8+r8(C)-1    : rnn.weight_ih_l0^T   (C, H)
      next r8(H) rows      : rnn.weight_hh_l0^T   (H, H)
      next r8(H) rows      : fc1.weight^T         (H, H)
      next r8(H) rows      : fc.weight^T          (H, E)
    """
    wih, whh, b_ih, b_hh, w1, b1, w2, b2 = params
    H, C = wih.shape
    E = w2.shape[0]
    Wd = max(H, E + 1)

    def pad_block(a, rows):
        blk = jnp.zeros((rows, Wd), jnp.float32)
        return blk.at[:a.shape[0], :a.shape[1]].set(a.astype(jnp.float32))

    bias_blk = jnp.zeros((8, Wd), jnp.float32)
    bias_blk = bias_blk.at[0, :H].set((b_ih + b_hh).astype(jnp.float32))
    bias_blk = bias_blk.at[1, :H].set(b1.astype(jnp.float32))
    bias_blk = bias_blk.at[2, :E].set(b2.astype(jnp.float32))

    slab = jnp.concatenate([
        bias_blk,
        pad_block(wih.T, _r8(C)),
        pad_block(whh.T, _r8(H)),
        pad_block(w1.T, _r8(H)),
        pad_block(w2.T, _r8(H)),
    ], axis=0)
    return slab, (C, H, E)


def contextualized_sigmoid_forward(context, observation, kparams, hidden=None):
    """context: (B, T, C), observation: (B*T, E). Returns (prob, hidden, theta)."""
    slab, (C, H, E) = kparams
    B, T, _ = context.shape
    BT = B * T
    Wd = slab.shape[1]

    if hidden is None:                                  # init_hidden -> zeros
        hidden = jnp.zeros((1, B, H), jnp.float32)
    else:
        hidden = hidden.astype(jnp.float32)

    vmem = pl.BlockSpec(memory_space=pltpu.MemorySpace.VMEM)
    out = pl.pallas_call(
        contextualized_sigmoid_kernel,
        out_shape=jax.ShapeDtypeStruct((BT + B, Wd), jnp.float32),
        in_specs=[vmem, vmem, vmem, vmem],
        out_specs=vmem,
    )(context.astype(jnp.float32), observation.astype(jnp.float32), hidden, slab)

    theta = out[:BT, :E]
    prob = out[:BT, E]
    hid = out[BT:BT + B, :H].reshape(1, B, H)
    return prob, hid, theta


def init_params(key, hidden_dim=16, context_size=6, input_size=6):
    """PyTorch-style parameter set (rnn, fc1, fc) with U(-1/sqrt(H), 1/sqrt(H)) init."""
    ks = jax.random.split(key, 8)
    b = 1.0 / (hidden_dim ** 0.5)
    u = lambda k, shape: jax.random.uniform(k, shape, jnp.float32, -b, b)
    wih = u(ks[0], (hidden_dim, context_size))   # rnn.weight_ih_l0
    whh = u(ks[1], (hidden_dim, hidden_dim))     # rnn.weight_hh_l0
    b_ih = u(ks[2], (hidden_dim,))               # rnn.bias_ih_l0
    b_hh = u(ks[3], (hidden_dim,))               # rnn.bias_hh_l0
    w1 = u(ks[4], (hidden_dim, hidden_dim))      # fc1.weight
    b1 = u(ks[5], (hidden_dim,))                 # fc1.bias
    w2 = u(ks[6], (input_size, hidden_dim))      # fc.weight
    b2 = u(ks[7], (input_size,))                 # fc.bias
    return (wih, whh, b_ih, b_hh, w1, b1, w2, b2)


def reference_forward(context, observation, params, hidden=None):
    """Pure-JAX replica of the PyTorch forward, for correctness checking."""
    wih, whh, b_ih, b_hh, w1, b1, w2, b2 = params
    B, T, C = context.shape
    H = whh.shape[0]
    hp = jax.lax.Precision.HIGHEST
    h = jnp.zeros((B, H), jnp.float32) if hidden is None else hidden[0]
    outs = []
    for t in range(T):
        h = jnp.tanh(jnp.dot(context[:, t, :], wih.T, precision=hp) + b_ih
                     + jnp.dot(h, whh.T, precision=hp) + b_hh)
        outs.append(h)
    theta = jnp.stack(outs, axis=1).reshape(-1, H)           # (B*T, H), (b, t) order
    theta = jnp.maximum(theta, 0.0)
    theta = jnp.maximum(jnp.dot(theta, w1.T, precision=hp) + b1, 0.0)
    theta = jnp.dot(theta, w2.T, precision=hp) + b2          # (B*T, E)
    logits_mat = jnp.dot(observation, theta.T, precision=hp)
    logits = jnp.diagonal(logits_mat)
    prob = jax.nn.sigmoid(logits)
    return prob, h[None], theta


if __name__ == "__main__":
    key = jax.random.PRNGKey(0)
    k_param, k_ctx, k_obs = jax.random.split(key, 3)

    B, T = 2, 8
    C, H, E = 6, 16, 6      # context_size, hidden_dim, input_size (module defaults)

    params = init_params(k_param, hidden_dim=H, context_size=C, input_size=E)
    context = jax.random.normal(k_ctx, (B, T, C), jnp.float32)
    observation = jax.random.normal(k_obs, (B * T, E), jnp.float32)

    kparams = prepare_kernel_params(params)
    prob, hidden, theta = contextualized_sigmoid_forward(context, observation, kparams)
    prob, hidden, theta = jax.block_until_ready((prob, hidden, theta))

    assert prob.shape == (B * T,), prob.shape
    assert hidden.shape == (1, B, H), hidden.shape
    assert theta.shape == (B * T, E), theta.shape

    prob_exp, hidden_exp, theta_exp = reference_forward(context, observation, params)
    assert jnp.allclose(prob, prob_exp, atol=1e-5, rtol=1e-5), \
        float(jnp.max(jnp.abs(prob - prob_exp)))
    assert jnp.allclose(hidden, hidden_exp, atol=1e-5, rtol=1e-5), \
        float(jnp.max(jnp.abs(hidden - hidden_exp)))
    assert jnp.allclose(theta, theta_exp, atol=1e-5, rtol=1e-5), \
        float(jnp.max(jnp.abs(theta - theta_exp)))

    print("KERNEL_OK")
</pallas_src>

<mosaic_0001>
module attributes {stable_mosaic.version = 11 : i64} {
  func.func @contextualized_sigmoid_kernel(%arg0: memref<2x8x6xf32, #tpu.memory_space<vmem>>, %arg1: memref<16x6xf32, #tpu.memory_space<vmem>>, %arg2: memref<1x2x16xf32, #tpu.memory_space<vmem>>, %arg3: memref<64x16xf32, #tpu.memory_space<vmem>>, %arg4: memref<18x16xf32, #tpu.memory_space<vmem>>) attributes {dimension_semantics = [], scalar_prefetch = 0 : i64, scratch_operands = 0 : i64, tpu.core_type = #tpu.core_type<tc>} {
    %c0 = arith.constant 0 : index
    %c0_0 = arith.constant 0 : index
    %0 = vector.load %arg3[%c0, %c0_0] : memref<64x16xf32, #tpu.memory_space<vmem>>, vector<64x16xf32>
    %1 = vector.extract_strided_slice %0 {offsets = [0, 0], sizes = [1, 16], strides = [1, 1]} : vector<64x16xf32> to vector<1x16xf32>
    %2 = vector.extract_strided_slice %0 {offsets = [1, 0], sizes = [1, 16], strides = [1, 1]} : vector<64x16xf32> to vector<1x16xf32>
    %3 = vector.extract_strided_slice %0 {offsets = [2, 0], sizes = [1, 6], strides = [1, 1]} : vector<64x16xf32> to vector<1x6xf32>
    %4 = vector.extract_strided_slice %0 {offsets = [8, 0], sizes = [6, 16], strides = [1, 1]} : vector<64x16xf32> to vector<6x16xf32>
    %5 = vector.extract_strided_slice %0 {offsets = [16, 0], sizes = [16, 16], strides = [1, 1]} : vector<64x16xf32> to vector<16x16xf32>
    %6 = vector.extract_strided_slice %0 {offsets = [32, 0], sizes = [16, 16], strides = [1, 1]} : vector<64x16xf32> to vector<16x16xf32>
    %7 = vector.extract_strided_slice %0 {offsets = [48, 0], sizes = [16, 6], strides = [1, 1]} : vector<64x16xf32> to vector<16x6xf32>
    %c0_1 = arith.constant 0 : index
    %c0_2 = arith.constant 0 : index
    %c0_3 = arith.constant 0 : index
    %8 = vector.load %arg0[%c0_1, %c0_2, %c0_3] : memref<2x8x6xf32, #tpu.memory_space<vmem>>, vector<2x8x6xf32>
    %9 = vector.shape_cast %8 : vector<2x8x6xf32> to vector<16x6xf32>
    %cst = arith.constant dense<0.000000e+00> : vector<16x16xf32>
    %10 = tpu.matmul %9, %4, %cst {dimension_numbers = #tpu.dot_dimension_numbers<[1], [0], [0], [1], [0, 0, 1, 1], [], []>} : vector<16x6xf32>, vector<6x16xf32>, vector<16x16xf32> -> vector<16x16xf32>
    %11 = vector.broadcast %1 : vector<1x16xf32> to vector<16x16xf32>
    %12 = arith.addf %10, %11 : vector<16x16xf32>
    %c0_4 = arith.constant 0 : index
    %c0_5 = arith.constant 0 : index
    %c0_6 = arith.constant 0 : index
    %13 = vector.load %arg2[%c0_4, %c0_5, %c0_6] : memref<1x2x16xf32, #tpu.memory_space<vmem>>, vector<1x2x16xf32>
    %14 = vector.shape_cast %13 : vector<1x2x16xf32> to vector<2x16xf32>
    %15 = vector.extract_strided_slice %12 {offsets = [0, 0], sizes = [1, 16], strides = [1, 1]} : vector<16x16xf32> to vector<1x16xf32>
    %16 = vector.extract_strided_slice %12 {offsets = [8, 0], sizes = [1, 16], strides = [1, 1]} : vector<16x16xf32> to vector<1x16xf32>
    %17 = tpu.concatenate %15, %16 in 0 : vector<1x16xf32>, vector<1x16xf32> -> vector<2x16xf32>
    %cst_7 = arith.constant dense<0.000000e+00> : vector<2x16xf32>
    %18 = tpu.matmul %14, %5, %cst_7 {dimension_numbers = #tpu.dot_dimension_numbers<[1], [0], [0], [1], [0, 0, 1, 1], [], []>} : vector<2x16xf32>, vector<16x16xf32>, vector<2x16xf32> -> vector<2x16xf32>
    %19 = arith.addf %18, %17 : vector<2x16xf32>
    %20 = math.tanh %19 : vector<2x16xf32>
    %21 = vector.extract_strided_slice %12 {offsets = [1, 0], sizes = [1, 16], strides = [1, 1]} : vector<16x16xf32> to vector<1x16xf32>
    %22 = vector.extract_strided_slice %12 {offsets = [9, 0], sizes = [1, 16], strides = [1, 1]} : vector<16x16xf32> to vector<1x16xf32>
    %23 = tpu.concatenate %21, %22 in 0 : vector<1x16xf32>, vector<1x16xf32> -> vector<2x16xf32>
    %cst_8 = arith.constant dense<0.000000e+00> : vector<2x16xf32>
    %24 = tpu.matmul %20, %5, %cst_8 {dimension_numbers = #tpu.dot_dimension_numbers<[1], [0], [0], [1], [0, 0, 1, 1], [], []>} : vector<2x16xf32>, vector<16x16xf32>, vector<2x16xf32> -> vector<2x16xf32>
    %25 = arith.addf %24, %23 : vector<2x16xf32>
    %26 = math.tanh %25 : vector<2x16xf32>
    %27 = vector.extract_strided_slice %12 {offsets = [2, 0], sizes = [1, 16], strides = [1, 1]} : vector<16x16xf32> to vector<1x16xf32>
    %28 = vector.extract_strided_slice %12 {offsets = [10, 0], sizes = [1, 16], strides = [1, 1]} : vector<16x16xf32> to vector<1x16xf32>
    %29 = tpu.concatenate %27, %28 in 0 : vector<1x16xf32>, vector<1x16xf32> -> vector<2x16xf32>
    %cst_9 = arith.constant dense<0.000000e+00> : vector<2x16xf32>
    %30 = tpu.matmul %26, %5, %cst_9 {dimension_numbers = #tpu.dot_dimension_numbers<[1], [0], [0], [1], [0, 0, 1, 1], [], []>} : vector<2x16xf32>, vector<16x16xf32>, vector<2x16xf32> -> vector<2x16xf32>
    %31 = arith.addf %30, %29 : vector<2x16xf32>
    %32 = math.tanh %31 : vector<2x16xf32>
    %33 = vector.extract_strided_slice %12 {offsets = [3, 0], sizes = [1, 16], strides = [1, 1]} : vector<16x16xf32> to vector<1x16xf32>
    %34 = vector.extract_strided_slice %12 {offsets = [11, 0], sizes = [1, 16], strides = [1, 1]} : vector<16x16xf32> to vector<1x16xf32>
    %35 = tpu.concatenate %33, %34 in 0 : vector<1x16xf32>, vector<1x16xf32> -> vector<2x16xf32>
    %cst_10 = arith.constant dense<0.000000e+00> : vector<2x16xf32>
    %36 = tpu.matmul %32, %5, %cst_10 {dimension_numbers = #tpu.dot_dimension_numbers<[1], [0], [0], [1], [0, 0, 1, 1], [], []>} : vector<2x16xf32>, vector<16x16xf32>, vector<2x16xf32> -> vector<2x16xf32>
    %37 = arith.addf %36, %35 : vector<2x16xf32>
    %38 = math.tanh %37 : vector<2x16xf32>
    %39 = vector.extract_strided_slice %12 {offsets = [4, 0], sizes = [1, 16], strides = [1, 1]} : vector<16x16xf32> to vector<1x16xf32>
    %40 = vector.extract_strided_slice %12 {offsets = [12, 0], sizes = [1, 16], strides = [1, 1]} : vector<16x16xf32> to vector<1x16xf32>
    %41 = tpu.concatenate %39, %40 in 0 : vector<1x16xf32>, vector<1x16xf32> -> vector<2x16xf32>
    %cst_11 = arith.constant dense<0.000000e+00> : vector<2x16xf32>
    %42 = tpu.matmul %38, %5, %cst_11 {dimension_numbers = #tpu.dot_dimension_numbers<[1], [0], [0], [1], [0, 0, 1, 1], [], []>} : vector<2x16xf32>, vector<16x16xf32>, vector<2x16xf32> -> vector<2x16xf32>
    %43 = arith.addf %42, %41 : vector<2x16xf32>
    %44 = math.tanh %43 : vector<2x16xf32>
    %45 = vector.extract_strided_slice %12 {offsets = [5, 0], sizes = [1, 16], strides = [1, 1]} : vector<16x16xf32> to vector<1x16xf32>
    %46 = vector.extract_strided_slice %12 {offsets = [13, 0], sizes = [1, 16], strides = [1, 1]} : vector<16x16xf32> to vector<1x16xf32>
    %47 = tpu.concatenate %45, %46 in 0 : vector<1x16xf32>, vector<1x16xf32> -> vector<2x16xf32>
    %cst_12 = arith.constant dense<0.000000e+00> : vector<2x16xf32>
    %48 = tpu.matmul %44, %5, %cst_12 {dimension_numbers = #tpu.dot_dimension_numbers<[1], [0], [0], [1], [0, 0, 1, 1], [], []>} : vector<2x16xf32>, vector<16x16xf32>, vector<2x16xf32> -> vector<2x16xf32>
    %49 = arith.addf %48, %47 : vector<2x16xf32>
    %50 = math.tanh %49 : vector<2x16xf32>
    %51 = vector.extract_strided_slice %12 {offsets = [6, 0], sizes = [1, 16], strides = [1, 1]} : vector<16x16xf32> to vector<1x16xf32>
    %52 = vector.extract_strided_slice %12 {offsets = [14, 0], sizes = [1, 16], strides = [1, 1]} : vector<16x16xf32> to vector<1x16xf32>
    %53 = tpu.concatenate %51, %52 in 0 : vector<1x16xf32>, vector<1x16xf32> -> vector<2x16xf32>
    %cst_13 = arith.constant dense<0.000000e+00> : vector<2x16xf32>
    %54 = tpu.matmul %50, %5, %cst_13 {dimension_numbers = #tpu.dot_dimension_numbers<[1], [0], [0], [1], [0, 0, 1, 1], [], []>} : vector<2x16xf32>, vector<16x16xf32>, vector<2x16xf32> -> vector<2x16xf32>
    %55 = arith.addf %54, %53 : vector<2x16xf32>
    %56 = math.tanh %55 : vector<2x16xf32>
    %57 = vector.extract_strided_slice %12 {offsets = [7, 0], sizes = [1, 16], strides = [1, 1]} : vector<16x16xf32> to vector<1x16xf32>
    %58 = vector.extract_strided_slice %12 {offsets = [15, 0], sizes = [1, 16], strides = [1, 1]} : vector<16x16xf32> to vector<1x16xf32>
    %59 = tpu.concatenate %57, %58 in 0 : vector<1x16xf32>, vector<1x16xf32> -> vector<2x16xf32>
    %cst_14 = arith.constant dense<0.000000e+00> : vector<2x16xf32>
    %60 = tpu.matmul %56, %5, %cst_14 {dimension_numbers = #tpu.dot_dimension_numbers<[1], [0], [0], [1], [0, 0, 1, 1], [], []>} : vector<2x16xf32>, vector<16x16xf32>, vector<2x16xf32> -> vector<2x16xf32>
    %61 = arith.addf %60, %59 : vector<2x16xf32>
    %62 = math.tanh %61 : vector<2x16xf32>
    %63 = vector.extract_strided_slice %20 {offsets = [0, 0], sizes = [1, 16], strides = [1, 1]} : vector<2x16xf32> to vector<1x16xf32>
    %64 = vector.extract_strided_slice %26 {offsets = [0, 0], sizes = [1, 16], strides = [1, 1]} : vector<2x16xf32> to vector<1x16xf32>
    %65 = vector.extract_strided_slice %32 {offsets = [0, 0], sizes = [1, 16], strides = [1, 1]} : vector<2x16xf32> to vector<1x16xf32>
    %66 = vector.extract_strided_slice %38 {offsets = [0, 0], sizes = [1, 16], strides = [1, 1]} : vector<2x16xf32> to vector<1x16xf32>
    %67 = vector.extract_strided_slice %44 {offsets = [0, 0], sizes = [1, 16], strides = [1, 1]} : vector<2x16xf32> to vector<1x16xf32>
    %68 = vector.extract_strided_slice %50 {offsets = [0, 0], sizes = [1, 16], strides = [1, 1]} : vector<2x16xf32> to vector<1x16xf32>
    %69 = vector.extract_strided_slice %56 {offsets = [0, 0], sizes = [1, 16], strides = [1, 1]} : vector<2x16xf32> to vector<1x16xf32>
    %70 = vector.extract_strided_slice %62 {offsets = [0, 0], sizes = [1, 16], strides = [1, 1]} : vector<2x16xf32> to vector<1x16xf32>
    %71 = tpu.concatenate %63, %64, %65, %66, %67, %68, %69, %70 in 0 : vector<1x16xf32>, vector<1x16xf32>, vector<1x16xf32>, vector<1x16xf32>, vector<1x16xf32>, vector<1x16xf32>, vector<1x16xf32>, vector<1x16xf32> -> vector<8x16xf32>
    %72 = vector.extract_strided_slice %20 {offsets = [1, 0], sizes = [1, 16], strides = [1, 1]} : vector<2x16xf32> to vector<1x16xf32>
    %73 = vector.extract_strided_slice %26 {offsets = [1, 0], sizes = [1, 16], strides = [1, 1]} : vector<2x16xf32> to vector<1x16xf32>
    %74 = vector.extract_strided_slice %32 {offsets = [1, 0], sizes = [1, 16], strides = [1, 1]} : vector<2x16xf32> to vector<1x16xf32>
    %75 = vector.extract_strided_slice %38 {offsets = [1, 0], sizes = [1, 16], strides = [1, 1]} : vector<2x16xf32> to vector<1x16xf32>
    %76 = vector.extract_strided_slice %44 {offsets = [1, 0], sizes = [1, 16], strides = [1, 1]} : vector<2x16xf32> to vector<1x16xf32>
    %77 = vector.extract_strided_slice %50 {offsets = [1, 0], sizes = [1, 16], strides = [1, 1]} : vector<2x16xf32> to vector<1x16xf32>
    %78 = vector.extract_strided_slice %56 {offsets = [1, 0], sizes = [1, 16], strides = [1, 1]} : vector<2x16xf32> to vector<1x16xf32>
    %79 = vector.extract_strided_slice %62 {offsets = [1, 0], sizes = [1, 16], strides = [1, 1]} : vector<2x16xf32> to vector<1x16xf32>
    %80 = tpu.concatenate %72, %73, %74, %75, %76, %77, %78, %79 in 0 : vector<1x16xf32>, vector<1x16xf32>, vector<1x16xf32>, vector<1x16xf32>, vector<1x16xf32>, vector<1x16xf32>, vector<1x16xf32>, vector<1x16xf32> -> vector<8x16xf32>
    %81 = tpu.concatenate %71, %80 in 0 : vector<8x16xf32>, vector<8x16xf32> -> vector<16x16xf32>
    %cst_15 = arith.constant 0.000000e+00 : f32
    %82 = vector.broadcast %cst_15 : f32 to vector<16x16xf32>
    %83 = arith.maximumf %81, %82 : vector<16x16xf32>
    %cst_16 = arith.constant dense<0.000000e+00> : vector<16x16xf32>
    %84 = tpu.matmul %83, %6, %cst_16 {dimension_numbers = #tpu.dot_dimension_numbers<[1], [0], [0], [1], [0, 0, 1, 1], [], []>} : vector<16x16xf32>, vector<16x16xf32>, vector<16x16xf32> -> vector<16x16xf32>
    %85 = vector.broadcast %2 : vector<1x16xf32> to vector<16x16xf32>
    %86 = arith.addf %84, %85 : vector<16x16xf32>
    %cst_17 = arith.constant 0.000000e+00 : f32
    %87 = vector.broadcast %cst_17 : f32 to vector<16x16xf32>
    %88 = arith.maximumf %86, %87 : vector<16x16xf32>
    %cst_18 = arith.constant dense<0.000000e+00> : vector<16x6xf32>
    %89 = tpu.matmul %88, %7, %cst_18 {dimension_numbers = #tpu.dot_dimension_numbers<[1], [0], [0], [1], [0, 0, 1, 1], [], []>} : vector<16x16xf32>, vector<16x6xf32>, vector<16x6xf32> -> vector<16x6xf32>
    %90 = vector.broadcast %3 : vector<1x6xf32> to vector<16x6xf32>
    %91 = arith.addf %89, %90 : vector<16x6xf32>
    %c0_19 = arith.constant 0 : index
    %c0_20 = arith.constant 0 : index
    %92 = vector.load %arg1[%c0_19, %c0_20] : memref<16x6xf32, #tpu.memory_space<vmem>>, vector<16x6xf32>
    %93 = arith.mulf %92, %91 : vector<16x6xf32>
    %cst_21 = arith.constant dense<0.000000e+00> : vector<16xf32>
    %94 = vector.multi_reduction <add>, %93, %cst_21 [1] : vector<16x6xf32> to vector<16xf32>
    %95 = vector.shape_cast %94 : vector<16xf32> to vector<16x1xf32>
    %96 = arith.negf %95 : vector<16x1xf32>
    %97 = math.exp %96 : vector<16x1xf32>
    %cst_22 = arith.constant 1.000000e+00 : f32
    %98 = vector.broadcast %cst_22 : f32 to vector<16x1xf32>
    %99 = arith.addf %98, %97 : vector<16x1xf32>
    %100 = arith.divf %98, %99 : vector<16x1xf32>
    %cst_23 = arith.constant 0.000000e+00 : f32
    %101 = vector.broadcast %cst_23 : f32 to vector<18x16xf32>
    %c0_24 = arith.constant 0 : index
    %c0_25 = arith.constant 0 : index
    %102 = vector.load %arg4[%c0_24, %c0_25] : memref<18x16xf32, #tpu.memory_space<vmem>>, vector<18x16xf32>
    tpu.vector_store %arg4[%c0_24, %c0_25], %101 {strides = array<i32>} : memref<18x16xf32, #tpu.memory_space<vmem>>, vector<18x16xf32>,
    %c0_26 = arith.constant 0 : index
    %c0_27 = arith.constant 0 : index
    %103 = vector.load %arg4[%c0_26, %c0_27] : memref<18x16xf32, #tpu.memory_space<vmem>>, vector<16x6xf32>
    tpu.vector_store %arg4[%c0_26, %c0_27], %91 {strides = array<i32>} : memref<18x16xf32, #tpu.memory_space<vmem>>, vector<16x6xf32>,
    %c0_28 = arith.constant 0 : index
    %c6 = arith.constant 6 : index
    %104 = vector.load %arg4[%c0_28, %c6] : memref<18x16xf32, #tpu.memory_space<vmem>>, vector<16x1xf32>
    tpu.vector_store %arg4[%c0_28, %c6], %100 {strides = array<i32>} : memref<18x16xf32, #tpu.memory_space<vmem>>, vector<16x1xf32>,
    %c16 = arith.constant 16 : index
    %c0_29 = arith.constant 0 : index
    %105 = vector.load %arg4[%c16, %c0_29] : memref<18x16xf32, #tpu.memory_space<vmem>>, vector<2x16xf32>
    tpu.vector_store %arg4[%c16, %c0_29], %62 {strides = array<i32>} : memref<18x16xf32, #tpu.memory_space<vmem>>, vector<2x16xf32>,
    return
  }
}

</mosaic_0001>

<bundles_post_ra>
// kernel: tpu_custom_call.1
= control target key start
LH: loop header
LB: loop body
LE: loop exit
PB: predicated region body
PF: predicated region fallthrough
CT: control target
= control target key end

     0   :  { %vm35_vm0 = vcmask 1045504   ;;  %vm28_vm1 = vcmask 48128   ;;  %vm68_vm2 = vcmask 130048   ;;  %vm66_vm3 = vcmask 1040384   ;;  %s643_s3 = inlined_call_operand.vmem [shape: f32[64,16], index: 3, kind: input, shape index: {}]   ;;  %s644_s0 = inlined_call_operand.vmem [shape: f32[2,8,6], index: 0, kind: input, shape index: {}]   ;;  %s645_s2 = inlined_call_operand.vmem [shape: f32[1,2,16], index: 2, kind: input, shape index: {}]   ;;  %s646_s4 = inlined_call_operand.vmem [shape: f32[18,16], index: 4, kind: output, shape index: {}]   ;;  %s647_s1 = inlined_call_operand.vmem [shape: f32[16,6], index: 1, kind: input, shape index: {}]  }
   0x1   :  { %v18_v0 = vld [vmem:[%s643_s3 + $0x8] sm:$0xff]  ;;  %v25_v1 = vld [vmem:[%s644_s0] sm:$0xff]  ;;  %v20_v2 = vld [vmem:[%s643_s3 + $0x18] sm:$0xff]  ;;  %vm311_vm4 = vcmask 1041408   ;;  %vm313_vm5 = vcmask 1042432   ;;  %vm315_vm6 = vcmask 1043456  }
   0x2   :  { %469 = vmatpush.msk.msra.mxu0 %vm35_vm0, %v18_v0  ;;  %v19_v3 = vld [vmem:[%s643_s3 + $0x10] sm:$0xff]  ;;  %86 = vmatpush.msra.mxu1 %v20_v2  ;;  %v62_v4 = vld [vmem:[%s645_s2] sm:$0x3]  ;;  %v26_v5 = vld [vmem:[%s644_s0 + $0x8] sm:$0xff]  ;;  %vm317_vm7 = vcmask 1044480   ;;  %vm457_vm8 = vcmask 123904  }
   0x3   :  { %470 = vmatmul.msk.f32.vlgmr.msra.gmra.mxu0 %vm28_vm1, %v25_v1  ;;  %143 = vmatpush.msra.mxu3 %v20_v2  ;;  %v562_v6 = vld [vmem:[%s643_s3] sm:$0xff]  ;;  %vm320_vm9 = vcmask 1046528   ;;  %vm461_vm12 = vcmask 56368  }
   0x4   :  { %114 = vmatpush.msrb.mxu0 %v20_v2  ;;  %87 = vmatpush.msra.mxu1 %v19_v3  ;;  %v27_v8 = vperm.slane %v562_v6, 0 }
   0x5   :  { %201 = vmatpush.msra.mxu2 %v20_v2  ;;  %472 = vmatmul.msk.f32.vlgmr.msra.gmra.mxu1 %vm68_vm2, %v62_v4 }
   0x6   :  { %115 = vmatpush.msrb.mxu0 %v19_v3  ;;  %144 = vmatpush.msra.mxu3 %v19_v3 }
   0x7   :  { %172 = vmatpush.msrb.mxu1 %v20_v2  ;;  %202 = vmatpush.msra.mxu2 %v19_v3 }
   0x8   :  { %230 = vmatpush.msrb.mxu3 %v20_v2  ;;  %259 = vmatpush.msra.mxu0 %v20_v2 }
   0x9   :  { %173 = vmatpush.msrb.mxu1 %v19_v3 }
   0xa   :  { %231 = vmatpush.msrb.mxu3 %v19_v3  ;;  %260 = vmatpush.msra.mxu0 %v19_v3 }
   0xb   :  { %288 = vmatpush.msra.mxu1 %v20_v2  ;;  %471 = vmatmul.msk.f32.gmra.mxu0 %vm28_vm1, %v26_v5 }
   0xd   :  { %289 = vmatpush.msra.mxu1 %v19_v3 }
  0x80   :  { %v56_v7 = vpop.f32.mrf.mxu0 }
  0x81   :  { %v57_v9 = vadd.f32 %v56_v7, %v27_v8 }
  0x82   :  { %v89_v19 = vpop.f32.mrf.mxu1 }
  0x83   :  { %v94_v12 = vrot.slane %v57_v9, 1  ;;  %v121_v13 = vrot.slane %v57_v9, 2  ;;  %v150_v14 = vrot.slane %v57_v9, 3  ;;  %v179_v15 = vrot.slane %v57_v9, 4 }
  0x84   :  { %v208_v16 = vrot.slane %v57_v9, 5  ;;  %v237_v17 = vrot.slane %v57_v9, 6  ;;  %v266_v30 = vrot.slane %v57_v9, 7 }
  0x88   :  { %v59_v10 = vpop.f32.mrf.mxu0 }
  0x89   :  { %v60_v11 = vadd.f32 %v59_v10, %v27_v8 }
  0x8b   :  { %v64_v18 = vrot.slane %v60_v11, 7  ;;  %v96_v20 = vsel %vm66_vm3, %v94_v12, %v60_v11  ;;  %v123_v21 = vrot.slane %v60_v11, 1  ;;  %v152_v22 = vrot.slane %v60_v11, 2 }
  0x8c   :  { %v181_v23 = vrot.slane %v60_v11, 3  ;;  %v210_v24 = vrot.slane %v60_v11, 4  ;;  %v239_v25 = vrot.slane %v60_v11, 5  ;;  %v268_v26 = vrot.slane %v60_v11, 6 }
  0x8d   :  { %v67_v27 = vsel %vm66_vm3, %v57_v9, %v64_v18  ;;  %v125_v28 = vsel %vm66_vm3, %v121_v13, %v123_v21  ;;  %v154_v29 = vsel %vm66_vm3, %v150_v14, %v152_v22  ;;  %v511_v18 = vmov 0.0  }
  0x8e   :  { %v90_v31 = vadd.f32 %v89_v19, %v67_v27  ;;  %v183_v32 = vsel %vm66_vm3, %v179_v15, %v181_v23  ;;  %v212_v33 = vsel %vm66_vm3, %v208_v16, %v210_v24  ;;  %v241_v34 = vsel %vm66_vm3, %v237_v17, %v239_v25  ;;  %v22_v16 = vld [vmem:[%s643_s3 + $0x28] sm:$0xff]  ;;  %v21_v17 = vld [vmem:[%s643_s3 + $0x20] sm:$0xff]  ;;  %455 = vst.msk [vmem:[%s646_s4] sm:$0xff] %vm68_vm2, %v511_v18  ;;  %v24_v19 = vld [vmem:[%s643_s3 + $0x38] sm:$0xff] }
  0x8f   :  { %v573_v35 = vsel %vm66_vm3, %v266_v30, %v268_v26  ;;  %366 = vmatpush.msrb.mxu2 %v22_v16  ;;  %458 = vst.msk [vmem:[%s646_s4 + $0x10] sm:$0x3] %vm457_vm8, %v511_v18  ;;  %v345_v30 = vperm.slane %v562_v6, 1 }
  0x90   :  { %487 = vtanh.f32 %v90_v31  ;;  %456 = vst.msk [vmem:[%s646_s4 + $0x8] sm:$0xff] %vm68_vm2, %v511_v18 }
  0x91   :  { %367 = vmatpush.msrb.mxu2 %v21_v17 }
  0x96   :  { %v488_v36 = vpop.eup %487 }
  0x97   :  { %473 = vmatmul.msk.f32.vlgmr.msrb.gmra.mxu0 %vm68_vm2, %v488_v36  ;;  %v322_v44 = vrot.slane %v488_v36, 1 }
 0x114   :  { %v117_v37 = vpop.f32.mrf.mxu0 }
 0x115   :  { %v118_v38 = vadd.f32 %v117_v37, %v96_v20  ;;  %v377_v37 = vperm.slane %v562_v6, 2  ;;  %v408_v6 = vld [vmem:[%s647_s1 + $0x8] sm:$0xff] }
 0x117   :  { %489 = vtanh.f32 %v118_v38 }
 0x11d   :  { %v490_v39 = vpop.eup %489 }
 0x11e   :  { %474 = vmatmul.msk.f32.vlgmr.msra.gmra.mxu3 %vm68_vm2, %v490_v39  ;;  %v295_v42 = vrot.slane %v490_v39, 7  ;;  %v336_v47 = vsel %vm66_vm3, %v322_v44, %v490_v39  ;;  %v407_v39 = vld [vmem:[%s647_s1] sm:$0xff] }
 0x11f   :  { %398 = vmatpush.msra.mxu3 %v24_v19 }
 0x120   :  { %v310_v48 = vsel %vm66_vm3, %v488_v36, %v295_v42 }
 0x1a1   :  { %v146_v40 = vpop.f32.mrf.mxu3 }
 0x1a2   :  { %v147_v41 = vadd.f32 %v146_v40, %v125_v28 }
 0x1a4   :  { %491 = vtanh.f32 %v147_v41 }
 0x1aa   :  { %v492_v43 = vpop.eup %491 }
 0x1ab   :  { %v297_v45 = vrot.slane %v492_v43, 6  ;;  %v324_v46 = vrot.slane %v492_v43, 7  ;;  %475 = vmatmul.msk.f32.vlgmr.msrb.gmra.mxu1 %vm68_vm2, %v492_v43 }
 0x1ad   :  { %v312_v49 = vsel %vm311_vm4, %v310_v48, %v297_v45  ;;  %v337_v50 = vsel %vm311_vm4, %v336_v47, %v324_v46 }
 0x228   :  { %v175_v51 = vpop.f32.mrf.mxu1 }
 0x229   :  { %v176_v52 = vadd.f32 %v175_v51, %v154_v29  ;;  %v23_v29 = vld [vmem:[%s643_s3 + $0x30] sm:$0xff] }
 0x22a   :  { %399 = vmatpush.msra.mxu3 %v23_v29 }
 0x22b   :  { %493 = vtanh.f32 %v176_v52 }
 0x231   :  { %v494_v53 = vpop.eup %493 }
 0x232   :  { %v299_v54 = vrot.slane %v494_v53, 5  ;;  %v326_v55 = vrot.slane %v494_v53, 6  ;;  %476 = vmatmul.msk.f32.vlgmr.msra.gmra.mxu2 %vm68_vm2, %v494_v53 }
 0x234   :  { %v314_v56 = vsel %vm313_vm5, %v312_v49, %v299_v54  ;;  %v338_v57 = vsel %vm313_vm5, %v337_v50, %v326_v55 }
 0x2b5   :  { %v204_v58 = vpop.f32.mrf.mxu2 }
 0x2b6   :  { %v205_v59 = vadd.f32 %v204_v58, %v183_v32 }
 0x2b8   :  { %495 = vtanh.f32 %v205_v59 }
 0x2be   :  { %v496_v60 = vpop.eup %495 }
 0x2bf   :  { %v301_v61 = vrot.slane %v496_v60, 4  ;;  %477 = vmatmul.msk.f32.vlgmr.msrb.gmra.mxu3 %vm68_vm2, %v496_v60  ;;  %v328_v62 = vrot.slane %v496_v60, 5 }
 0x2c1   :  { %v316_v63 = vsel %vm315_vm6, %v314_v56, %v301_v61  ;;  %v339_v0 = vsel %vm315_vm6, %v338_v57, %v328_v62 }
 0x342   :  { %v233_v1 = vpop.f32.mrf.mxu3 }
 0x343   :  { %v234_v2 = vadd.f32 %v233_v1, %v212_v33 }
 0x345   :  { %497 = vtanh.f32 %v234_v2 }
 0x34b   :  { %v498_v3 = vpop.eup %497 }
 0x34c   :  { %478 = vmatmul.msk.f32.vlgmr.msra.gmra.mxu0 %vm68_vm2, %v498_v3  ;;  %v303_v4 = vrot.slane %v498_v3, 3  ;;  %v330_v5 = vrot.slane %v498_v3, 4 }
 0x34e   :  { %v318_v7 = vsel %vm317_vm7, %v316_v63, %v303_v4  ;;  %v340_v8 = vsel %vm317_vm7, %v339_v0, %v330_v5 }
 0x3c9   :  { %v262_v9 = vpop.f32.mrf.mxu0 }
 0x3ca   :  { %v263_v10 = vadd.f32 %v262_v9, %v241_v34 }
 0x3cc   :  { %499 = vtanh.f32 %v263_v10 }
 0x3d2   :  { %v500_v11 = vpop.eup %499 }
 0x3d3   :  { %479 = vmatmul.msk.f32.vlgmr.msra.gmra.mxu1 %vm68_vm2, %v500_v11  ;;  %v305_v12 = vrot.slane %v500_v11, 2  ;;  %v332_v13 = vrot.slane %v500_v11, 3 }
 0x3d5   :  { %v319_v14 = vsel %vm35_vm0, %v318_v7, %v305_v12  ;;  %v341_v15 = vsel %vm35_vm0, %v340_v8, %v332_v13 }
 0x450   :  { %v291_v20 = vpop.f32.mrf.mxu1 }
 0x451   :  { %v292_v21 = vadd.f32 %v291_v20, %v573_v35 }
 0x453   :  { %501 = vtanh.f32 %v292_v21 }
 0x459   :  { %v502_v22 = vpop.eup %501 }
 0x45a   :  { %v308_v23 = vrot.slane %v502_v22, 1  ;;  %v334_v24 = vrot.slane %v502_v22, 2  ;;  %464 = vst.msk [vmem:[%s646_s4 + $0x10] sm:$0x3] %vm457_vm8, %v502_v22 }
 0x45c   :  { %v321_v25 = vsel %vm320_vm9, %v319_v14, %v308_v23  ;;  %v342_v26 = vsel %vm320_vm9, %v341_v15, %v334_v24 }
 0x45d   :  { %v343_v27 = vmax.f32 %v321_v25, 0.0  ;;  %v344_v28 = vmax.f32 %v342_v26, 0.0 }
 0x45f   :  { %480 = vmatmul.msk.f32.vlgmr.msrb.gmra.mxu2 %vm68_vm2, %v343_v27 }
 0x467   :  { %481 = vmatmul.msk.f32.gmra.mxu2 %vm68_vm2, %v344_v28 }
 0x4e2   :  { %v369_v31 = vpop.f32.mrf.mxu2 }
 0x4e3   :  { %v370_v32 = vadd.f32 %v369_v31, %v345_v30 }
 0x4e5   :  { %v375_v33 = vmax.f32 %v370_v32, 0.0 }
 0x4e7   :  { %482 = vmatmul.msk.f32.vlgmr.msra.gmra.mxu3 %vm68_vm2, %v375_v33 }
 0x4ea   :  { %v372_v34 = vpop.f32.mrf.mxu2 }
 0x4eb   :  { %v373_v35 = vadd.f32 %v372_v34, %v345_v30 }
 0x4ed   :  { %v376_v36 = vmax.f32 %v373_v35, 0.0 }
 0x4ef   :  { %483 = vmatmul.msk.f32.gmra.mxu3 %vm68_vm2, %v376_v36 }
 0x56a   :  { %v401_v38 = vpop.f32.mrf.mxu3 }
 0x56b   :  { %v402_v40 = vadd.f32 %v401_v38, %v377_v37 }
 0x56d   :  { %459 = vst.msk [vmem:[%s646_s4] sm:$0xff] %vm28_vm1, %v402_v40  ;;  %v409_v41 = vmul.f32 %v407_v39, %v402_v40 }
 0x56f   :  { %v411_v42 = vsel %vm28_vm1, %v409_v41, 0.0 }
 0x570   :  { %412 = vadd.xlane.f32.xlu0 %v411_v42 }
 0x572   :  { %v404_v43 = vpop.f32.mrf.mxu3 }
 0x573   :  { %v405_v44 = vadd.f32 %v404_v43, %v377_v37 }
 0x575   :  { %460 = vst.msk [vmem:[%s646_s4 + $0x8] sm:$0xff] %vm28_vm1, %v405_v44  ;;  %v410_v45 = vmul.f32 %v408_v6, %v405_v44 }
 0x577   :  { %v414_v46 = vsel %vm28_vm1, %v410_v45, 0.0 }
 0x578   :  { %415 = vadd.xlane.f32.xlu0 %v414_v46 }
 0x5e3   :  { %v413_v47 = vpop.xlane.xlu0 %412 }
 0x5e4   :  { %v484_v48 = vmul.f32 -1.442695, %v413_v47 }
 0x5e6   :  { %503 = vpow2.f32 %v484_v48 }
 0x5eb   :  { %v416_v49 = vpop.xlane.xlu0 %415 }
 0x5ec   :  { %v504_v50 = vpop.eup %503  ;;  %v485_v51 = vmul.f32 -1.442695, %v416_v49 }
 0x5ed   :  { %v423_v52 = vadd.f32 1.0, %v504_v50 }
 0x5ee   :  { %505 = vpow2.f32 %v485_v51 }
 0x5ef   :  { %507 = vrcp.f32 %v423_v52  ;;  %v436_v58 = vand.u32 2147483648, %v423_v52  ;;  %v434_v60 = vand.u32 2147483647, %v423_v52  ;;  %vm430_vm11 = vweird.f32 %v423_v52 }
 0x5f1   :  { %v437_v63 = vor.u32 1.1754944e-38, %v436_v58  ;;  %vm435_vm14 = vcmp.eq.f32.partialorder %v434_v60, 8.507059e+37 }
 0x5f4   :  { %v506_v53 = vpop.eup %505 }
 0x5f5   :  { %v508_v54 = vpop.eup %507  ;;  %v424_v55 = vadd.f32 1.0, %v506_v53 }
 0x5f6   :  { %v426_v56 = vmul.f32 %v508_v54, %v423_v52  ;;  %vm431_vm10 = vweird.f32 %v508_v54 }
 0x5f7   :  { %509 = vrcp.f32 %v424_v55  ;;  %vm432_vm13 = vmor %vm430_vm11, %vm431_vm10  ;;  %v451_v4 = vand.u32 2147483648, %v424_v55  ;;  %v449_v7 = vand.u32 2147483647, %v424_v55  ;;  %vm445_vm0 = vweird.f32 %v424_v55 }
 0x5f8   :  { %v427_v57 = vsub.f32 1.0, %v426_v56 }
 0x5f9   :  { %v452_v9 = vor.u32 1.1754944e-38, %v451_v4  ;;  %vm450_vm2 = vcmp.eq.f32.partialorder %v449_v7, 8.507059e+37 }
 0x5fa   :  { %v428_v59 = vmul.f32 %v508_v54, %v427_v57 }
 0x5fc   :  { %v429_v61 = vadd.f32 %v508_v54, %v428_v59 }
 0x5fd   :  { %v510_v62 = vpop.eup %509 }
 0x5fe   :  { %v433_v0 = vsel %vm432_vm13, %v508_v54, %v429_v61  ;;  %v441_v1 = vmul.f32 %v510_v62, %v424_v55  ;;  %vm446_vm15 = vweird.f32 %v510_v62 }
 0x5ff   :  { %v438_v2 = vsel %vm435_vm14, %v437_v63, %v433_v0  ;;  %vm447_vm1 = vmor %vm445_vm0, %vm446_vm15 }
 0x600   :  { %462 = vst.msk [vmem:[%s646_s4] sm:$0xff] %vm461_vm12, %v438_v2  ;;  %v442_v3 = vsub.f32 1.0, %v441_v1 }
 0x602   :  { %v443_v5 = vmul.f32 %v510_v62, %v442_v3 }
 0x604   :  { %v444_v8 = vadd.f32 %v510_v62, %v443_v5 }
 0x606   :  { %v448_v10 = vsel %vm447_vm1, %v510_v62, %v444_v8 }
 0x607   :  { %v453_v11 = vsel %vm450_vm2, %v452_v9, %v448_v10 }
 0x608   :  { %463 = vst.msk [vmem:[%s646_s4 + $0x8] sm:$0xff] %vm461_vm12, %v453_v11 }

</bundles_post_ra>
